<compile_context>
chip_gen: v7x
topology: tpu7x:2x2x1
jax: 0.10.0
libtpu: 0.0.40
codegen_flags: <defaults>
</compile_context>

<pallas_src>
import functools

import jax
import jax.numpy as jnp
from jax.experimental import pallas as pl
from jax.experimental.pallas import tpu as pltpu

_LANE = 128  # vreg lane width


def _round_up(x: int, m: int) -> int:
    return (x + m - 1) // m * m


def _pad2d(a, rows, cols):
    """Zero-pad a 2-D array to (rows, cols) (no-op if already that shape)."""
    pr, pc = rows - a.shape[0], cols - a.shape[1]
    if pr == 0 and pc == 0:
        return a
    return jnp.pad(a, ((0, pr), (0, pc)))


def prepare_actor_params(params, dtype=jnp.float32):
    """Pad hidden dims of the weights to 128 lanes ONCE (outside the per-call path).

    params: [(W1, b1), (W2, b2), (W3, b3)] with W (in_dim, out_dim), b (1, out_dim)
    dtype:  storage dtype for the weight matrices (jnp.bfloat16 halves streamed /
            resident weight bytes on v6e/v7x; accumulation stays f32 in-kernel).
    Biases stay f32 (they are added to the f32 accumulator).
    """
    (w1, b1), (w2, b2), (w3, b3) = params
    obs_dim, h1 = w1.shape
    h2 = w2.shape[1]
    act_dim = w3.shape[1]
    h1_p, h2_p = _round_up(h1, _LANE), _round_up(h2, _LANE)

    w1p = _pad2d(w1, obs_dim, h1_p).astype(dtype)
    b1p = _pad2d(b1.reshape(1, -1), 1, h1_p).astype(jnp.float32)
    w2p = _pad2d(w2, h1_p, h2_p).astype(dtype)
    b2p = _pad2d(b2.reshape(1, -1), 1, h2_p).astype(jnp.float32)
    w3p = _pad2d(w3, h2_p, act_dim).astype(dtype)
    b3p = b3.reshape(1, -1).astype(jnp.float32)
    return (w1p, b1p, w2p, b2p, w3p, b3p)


def make_actor_kernel(act_limit: float):
    """act_limit is a compile-time Python float closed over by the kernel."""

    def actor_kernel(obs_ref,                 # (TILE_B, obs_dim)   streamed
                     w1_ref, b1_ref,          # (obs_dim, h1_p), (1, h1_p)  resident
                     w2_ref, b2_ref,          # (h1_p, h2_p),   (1, h2_p)  resident
                     w3_ref, b3_ref,          # (h2_p, act_dim),(1, act_dim) resident
                     out_ref):                # (TILE_B, act_dim)   streamed
        cdt = w1_ref.dtype                    # f32 (default) or bf16 weights
        x = obs_ref[...].astype(cdt)
        # Layer 1: Linear + ReLU (MXU matmul, f32 accumulate)
        h = jnp.dot(x, w1_ref[...], preferred_element_type=jnp.float32) + b1_ref[...]
        h = jnp.maximum(h, 0.0)
        # Layer 2: Linear + ReLU
        h = jnp.dot(h.astype(cdt), w2_ref[...],
                    preferred_element_type=jnp.float32) + b2_ref[...]
        h = jnp.maximum(h, 0.0)
        # Output layer: Linear + Tanh (EUP), scaled by compile-time act_limit
        a = jnp.dot(h.astype(cdt), w3_ref[...],
                    preferred_element_type=jnp.float32) + b3_ref[...]
        out_ref[...] = (act_limit * jnp.tanh(a)).astype(out_ref.dtype)

    return actor_kernel


@functools.partial(jax.jit, static_argnames=("act_limit", "tile_b"))
def mlp_actor_forward(obs, padded_params, act_limit: float, tile_b: int = 1024):
    """Pallas wrapper.

    obs:           (B, obs_dim) float32 — streamed, NOT padded in HBM.
    padded_params: output of prepare_actor_params() (weights padded once at init).
    """
    w1p, b1p, w2p, b2p, w3p, b3p = padded_params
    B, obs_dim = obs.shape
    h1_p, h2_p, act_dim = w1p.shape[1], w2p.shape[1], w3p.shape[1]

    # --- batch tiling --------------------------------------------------------
    tile_b = _round_up(max(int(tile_b), 8), 8)
    if B <= tile_b:
        if B >= 1024:
            # big enough to split: give v7x's 2 TensorCores one tile each
            tile = _round_up((B + 1) // 2, 8)
        else:
            tile = B                      # single block; block == full dim is legal
    else:
        tile = tile_b                     # multiple of 8 sublanes
    n_tiles = pl.cdiv(B, tile)            # ragged last block: OOB reads are garbage
                                          # rows (per-row independent), OOB writes dropped

    # --- VMEM budget (cap < v7x's 64 MiB physical VMEM) ----------------------
    f32 = 4
    wbytes = jnp.dtype(w1p.dtype).itemsize
    bytes_w = ((w1p.size + w2p.size + w3p.size) * wbytes
               + (b1p.size + b2p.size + b3p.size) * f32)
    bytes_io = f32 * tile * (obs_dim + act_dim)        # streamed tile in + out
    bytes_act = f32 * tile * (h1_p + h2_p)             # activation temporaries
    vmem_limit = 2 * bytes_w + 2 * bytes_io + 2 * bytes_act + (4 << 20)
    vmem_limit = int(min(max(vmem_limit, 8 << 20), 48 << 20))

    # --- cost estimate: true (unpadded) streamed bytes ------------------------
    flops = 2 * B * (obs_dim * h1_p + h1_p * h2_p + h2_p * act_dim)
    cost = pl.CostEstimate(
        flops=flops,
        transcendentals=B * act_dim,
        bytes_accessed=f32 * B * (obs_dim + act_dim) + bytes_w,
    )

    stream = lambda feat: pl.BlockSpec((tile, feat), lambda i: (i, 0))
    resident = lambda shape: pl.BlockSpec(shape, lambda i: (0, 0))

    out = pl.pallas_call(
        make_actor_kernel(float(act_limit)),
        out_shape=jax.ShapeDtypeStruct((B, act_dim), jnp.float32),
        grid=(n_tiles,),
        in_specs=[
            stream(obs_dim),                 # obs tile (streamed, lane dim = true dim)
            resident(w1p.shape), resident(b1p.shape),
            resident(w2p.shape), resident(b2p.shape),
            resident(w3p.shape), resident(b3p.shape),
        ],
        out_specs=stream(act_dim),
        compiler_params=pltpu.CompilerParams(
            dimension_semantics=("parallel",),   # shard batch tiles over v7x's 2 TCs
            vmem_limit_bytes=vmem_limit,
        ),
        cost_estimate=cost,
    )(obs, w1p, b1p, w2p, b2p, w3p, b3p)

    return out


def init_linear(key, fan_in, fan_out):
    """Deterministic init mirroring torch.nn.Linear default (uniform +/- 1/sqrt(fan_in))."""
    kw, kb = jax.random.split(key)
    bound = 1.0 / jnp.sqrt(jnp.asarray(fan_in, jnp.float32))
    w = jax.random.uniform(kw, (fan_in, fan_out), jnp.float32, -bound, bound)
    b = jax.random.uniform(kb, (1, fan_out), jnp.float32, -bound, bound)
    return w, b


def reference_forward(obs, params, act_limit):
    (w1, b1), (w2, b2), (w3, b3) = params
    h = jnp.maximum(obs @ w1 + b1, 0.0)
    h = jnp.maximum(h @ w2 + b2, 0.0)
    return act_limit * jnp.tanh(h @ w3 + b3)


if __name__ == "__main__":
    # Small shapes consistent with the module: obs_dim=16, hidden=(32, 32), act_dim=8.
    batch, obs_dim, act_dim = 8, 16, 8
    hidden_sizes = (32, 32)
    act_limit = 2.0

    key = jax.random.PRNGKey(0)
    k_obs, k_obs_big, k1, k2, k3 = jax.random.split(key, 5)

    sizes = [obs_dim] + list(hidden_sizes) + [act_dim]
    params = [
        init_linear(k1, sizes[0], sizes[1]),
        init_linear(k2, sizes[1], sizes[2]),
        init_linear(k3, sizes[2], sizes[3]),
    ]

    # Pad/prepare weights ONCE (outside the per-call forward path).
    padded_params = prepare_actor_params(params)          # f32 (bit-comparable)
    # For v6e/v7x throughput: prepare_actor_params(params, dtype=jnp.bfloat16)

    # --- tiny-batch RL case (single tile, single kernel launch) --------------
    obs = jax.random.normal(k_obs, (batch, obs_dim), jnp.float32)
    out = jax.block_until_ready(mlp_actor_forward(obs, padded_params, act_limit))
    ref = reference_forward(obs, params, act_limit)
    assert out.shape == (batch, act_dim)
    assert jnp.allclose(out, ref, atol=1e-5, rtol=1e-5), "mismatch vs JAX reference (small)"

    # --- gridded case: 2 parallel batch tiles (v7x megacore sharding path) ---
    big_b = 2048
    obs_big = jax.random.normal(k_obs_big, (big_b, obs_dim), jnp.float32)
    out_big = jax.block_until_ready(mlp_actor_forward(obs_big, padded_params, act_limit))
    ref_big = reference_forward(obs_big, params, act_limit)
    assert out_big.shape == (big_b, act_dim)
    assert jnp.allclose(out_big, ref_big, atol=1e-4, rtol=1e-4), "mismatch vs JAX reference (big)"

    print("KERNEL_OK")
</pallas_src>

<mosaic_0001>
module attributes {stable_mosaic.version = 11 : i64} {
  func.func @actor_kernel(%arg0: i32, %arg1: memref<8x16xf32, #tpu.memory_space<vmem>>, %arg2: memref<16x128xf32, #tpu.memory_space<vmem>>, %arg3: memref<1x128xf32, #tpu.memory_space<vmem>>, %arg4: memref<128x128xf32, #tpu.memory_space<vmem>>, %arg5: memref<1x128xf32, #tpu.memory_space<vmem>>, %arg6: memref<128x8xf32, #tpu.memory_space<vmem>>, %arg7: memref<1x8xf32, #tpu.memory_space<vmem>>, %arg8: memref<8x8xf32, #tpu.memory_space<vmem>>) attributes {dimension_semantics = [#tpu.dimension_semantics<parallel>], iteration_bounds = array<i64: 1>, scalar_prefetch = 0 : i64, scratch_operands = 0 : i64, tpu.core_type = #tpu.core_type<tc>, window_params = [{transform_indices = @transform_0, window_bounds = array<i64: 8, 16>}, {pipeline_mode = #tpu.pipeline_mode<synchronous>, transform_indices = @transform_1, window_bounds = array<i64: 16, 128>}, {pipeline_mode = #tpu.pipeline_mode<synchronous>, transform_indices = @transform_2, window_bounds = array<i64: 1, 128>}, {pipeline_mode = #tpu.pipeline_mode<synchronous>, transform_indices = @transform_3, window_bounds = array<i64: 128, 128>}, {pipeline_mode = #tpu.pipeline_mode<synchronous>, transform_indices = @transform_4, window_bounds = array<i64: 1, 128>}, {pipeline_mode = #tpu.pipeline_mode<synchronous>, transform_indices = @transform_5, window_bounds = array<i64: 128, 8>}, {pipeline_mode = #tpu.pipeline_mode<synchronous>, transform_indices = @transform_6, window_bounds = array<i64: 1, 8>}, {transform_indices = @transform_7, window_bounds = array<i64: 8, 8>}]} {
    %c0 = arith.constant 0 : index
    %c0_0 = arith.constant 0 : index
    %0 = vector.load %arg1[%c0, %c0_0] : memref<8x16xf32, #tpu.memory_space<vmem>>, vector<8x16xf32>
    %c0_1 = arith.constant 0 : index
    %c0_2 = arith.constant 0 : index
    %1 = vector.load %arg2[%c0_1, %c0_2] : memref<16x128xf32, #tpu.memory_space<vmem>>, vector<16x128xf32>
    %cst = arith.constant dense<0.000000e+00> : vector<8x128xf32>
    %2 = tpu.matmul %0, %1, %cst {dimension_numbers = #tpu.dot_dimension_numbers<[1], [0], [0], [1], [0, 0, 1, 1], [], []>} : vector<8x16xf32>, vector<16x128xf32>, vector<8x128xf32> -> vector<8x128xf32>
    %c0_3 = arith.constant 0 : index
    %c0_4 = arith.constant 0 : index
    %3 = vector.load %arg3[%c0_3, %c0_4] : memref<1x128xf32, #tpu.memory_space<vmem>>, vector<1x128xf32>
    %4 = vector.broadcast %3 : vector<1x128xf32> to vector<8x128xf32>
    %5 = arith.addf %2, %4 : vector<8x128xf32>
    %cst_5 = arith.constant 0.000000e+00 : f32
    %6 = vector.broadcast %cst_5 : f32 to vector<8x128xf32>
    %7 = arith.maximumf %5, %6 : vector<8x128xf32>
    %c0_6 = arith.constant 0 : index
    %c0_7 = arith.constant 0 : index
    %8 = vector.load %arg4[%c0_6, %c0_7] : memref<128x128xf32, #tpu.memory_space<vmem>>, vector<128x128xf32>
    %cst_8 = arith.constant dense<0.000000e+00> : vector<8x128xf32>
    %9 = tpu.matmul %7, %8, %cst_8 {dimension_numbers = #tpu.dot_dimension_numbers<[1], [0], [0], [1], [0, 0, 1, 1], [], []>} : vector<8x128xf32>, vector<128x128xf32>, vector<8x128xf32> -> vector<8x128xf32>
    %c0_9 = arith.constant 0 : index
    %c0_10 = arith.constant 0 : index
    %10 = vector.load %arg5[%c0_9, %c0_10] : memref<1x128xf32, #tpu.memory_space<vmem>>, vector<1x128xf32>
    %11 = vector.broadcast %10 : vector<1x128xf32> to vector<8x128xf32>
    %12 = arith.addf %9, %11 : vector<8x128xf32>
    %cst_11 = arith.constant 0.000000e+00 : f32
    %13 = vector.broadcast %cst_11 : f32 to vector<8x128xf32>
    %14 = arith.maximumf %12, %13 : vector<8x128xf32>
    %c0_12 = arith.constant 0 : index
    %c0_13 = arith.constant 0 : index
    %15 = vector.load %arg6[%c0_12, %c0_13] : memref<128x8xf32, #tpu.memory_space<vmem>>, vector<128x8xf32>
    %cst_14 = arith.constant dense<0.000000e+00> : vector<8x8xf32>
    %16 = tpu.matmul %14, %15, %cst_14 {dimension_numbers = #tpu.dot_dimension_numbers<[1], [0], [0], [1], [0, 0, 1, 1], [], []>} : vector<8x128xf32>, vector<128x8xf32>, vector<8x8xf32> -> vector<8x8xf32>
    %c0_15 = arith.constant 0 : index
    %c0_16 = arith.constant 0 : index
    %17 = vector.load %arg7[%c0_15, %c0_16] : memref<1x8xf32, #tpu.memory_space<vmem>>, vector<1x8xf32>
    %18 = vector.broadcast %17 : vector<1x8xf32> to vector<8x8xf32>
    %19 = arith.addf %16, %18 : vector<8x8xf32>
    %20 = math.tanh %19 : vector<8x8xf32>
    %cst_17 = arith.constant 2.000000e+00 : f32
    %21 = vector.broadcast %cst_17 : f32 to vector<8x8xf32>
    %22 = arith.mulf %21, %20 : vector<8x8xf32>
    %c0_18 = arith.constant 0 : index
    %c0_19 = arith.constant 0 : index
    %23 = vector.load %arg8[%c0_18, %c0_19] : memref<8x8xf32, #tpu.memory_space<vmem>>, vector<8x8xf32>
    tpu.vector_store %arg8[%c0_18, %c0_19], %22 {strides = array<i32>} : memref<8x8xf32, #tpu.memory_space<vmem>>, vector<8x8xf32>,
    return
  }
  func.func @transform_0(%arg0: i32) -> (i32, i32) {
    %c0_i32 = arith.constant 0 : i32
    %c0_i32_0 = arith.constant 0 : i32
    return %arg0, %c0_i32 : i32, i32
  }
  func.func @transform_1(%arg0: i32) -> (i32, i32) {
    %c0_i32 = arith.constant 0 : i32
    %c0_i32_0 = arith.constant 0 : i32
    %c0_i32_1 = arith.constant 0 : i32
    return %c0_i32, %c0_i32_0 : i32, i32
  }
  func.func @transform_2(%arg0: i32) -> (i32, i32) {
    %c0_i32 = arith.constant 0 : i32
    %c0_i32_0 = arith.constant 0 : i32
    %c0_i32_1 = arith.constant 0 : i32
    return %c0_i32, %c0_i32_0 : i32, i32
  }
  func.func @transform_3(%arg0: i32) -> (i32, i32) {
    %c0_i32 = arith.constant 0 : i32
    %c0_i32_0 = arith.constant 0 : i32
    %c0_i32_1 = arith.constant 0 : i32
    return %c0_i32, %c0_i32_0 : i32, i32
  }
  func.func @transform_4(%arg0: i32) -> (i32, i32) {
    %c0_i32 = arith.constant 0 : i32
    %c0_i32_0 = arith.constant 0 : i32
    %c0_i32_1 = arith.constant 0 : i32
    return %c0_i32, %c0_i32_0 : i32, i32
  }
  func.func @transform_5(%arg0: i32) -> (i32, i32) {
    %c0_i32 = arith.constant 0 : i32
    %c0_i32_0 = arith.constant 0 : i32
    %c0_i32_1 = arith.constant 0 : i32
    return %c0_i32, %c0_i32_0 : i32, i32
  }
  func.func @transform_6(%arg0: i32) -> (i32, i32) {
    %c0_i32 = arith.constant 0 : i32
    %c0_i32_0 = arith.constant 0 : i32
    %c0_i32_1 = arith.constant 0 : i32
    return %c0_i32, %c0_i32_0 : i32, i32
  }
  func.func @transform_7(%arg0: i32) -> (i32, i32) {
    %c0_i32 = arith.constant 0 : i32
    %c0_i32_0 = arith.constant 0 : i32
    return %arg0, %c0_i32 : i32, i32
  }
}

</mosaic_0001>

<bundles_post_ra>
// kernel: mlp_actor_forward.1
= control target key start
LH: loop header
LB: loop body
LE: loop exit
PB: predicated region body
PF: predicated region fallthrough
CT: control target
= control target key end

     0   :  { %12 = vsyncpa [#allocation3], 0  ;;  %s754_s0 = inlined_call_operand.hbm [shape: f32[8,16], index: 0, kind: input, shape index: {}]   ;;  %s755_s1 = inlined_call_operand.vmem [shape: f32[16,128], index: 1, kind: input, shape index: {}]   ;;  %s756_s2 = inlined_call_operand.vmem [shape: f32[1,128], index: 2, kind: input, shape index: {}]   ;;  %s757_s3 = inlined_call_operand.vmem [shape: f32[128,128], index: 3, kind: input, shape index: {}]   ;;  %s758_s4 = inlined_call_operand.vmem [shape: f32[1,128], index: 4, kind: input, shape index: {}]   ;;  %s759_s5 = inlined_call_operand.vmem [shape: f32[128,8], index: 5, kind: input, shape index: {}]   ;;  %s760_s6 = inlined_call_operand.vmem [shape: f32[1,8], index: 6, kind: input, shape index: {}]   ;;  %s761_s7 = inlined_call_operand.hbm [shape: f32[8,8], index: 7, kind: output, shape index: {}]  }
   0x1   :  { %13 = vsyncpa [#allocation4], 0  ;;  %s554_s24 = smov [#allocation2]   ;;  %s506_s28 = scalar_lea.hbm %s754_s0, 128 }
   0x2   :  { %s20_s25 = sshll.u32 %s554_s24, 4  ;;  %p507_p0 = scmp.ne.s32.totalorder %s754_s0, %s506_s28  ;;  %s21_s25 = int_to_ptr.vmem [resolvable:$true] %s20_s25 }
   0x3   :  { %p510_p1 = scmp.lt.u32.totalorder %s506_s28, %s754_s0 }
   0x5   :  { %p512_p2 = pnand %p510_p1, %p507_p0 }
   0x7   :  { %515 = shalt.err (!%p512_p2)
}
   0x8   :  { %s516_s10 = scalar_lea.vmem %s21_s25, 128  ;;  %p521_p4 = scmp.lt.s32.totalorder %s21_s25, %s21_s25 }
   0x9   :  { %p517_p3 = scmp.ne.s32.totalorder %s21_s25, %s516_s10  ;;  %p522_p5 = scmp.lt.s32.totalorder %s516_s10, %s516_s10 }
   0xb   :  { %p523_p6 = por %p522_p5, %p521_p4 }
   0xd   :  { %p524_p7 = pnand %p523_p6, %p517_p3 }
   0xf   :  { %527 = shalt.err (!%p524_p7)
}
  0x10   :  { %23 = dma.hbm_to_vmem [thread:$0]  %s754_s0, 128, %s21_s25, [#allocation3]  }
  0x11   :  { %550 = dma.done.wait [#allocation3], 128  }
  0x12   :  { %551 = vsyncadd [#allocation3], 4294967168  ;;  %v555_v0 = vmov 0.0|0.0   ;;  %vm556_vm0 = vmmov 0   ;;  %v557_v1 = vmov 0.0   ;;  %v40_v2 = vld [vmem:[%s755_s1] sm:$0xff] }
  0x13   :  { %448 = vmatprep.subr.bf16.mxu0 %v555_v0  ;;  %375 = vmatprep.mubr.msk.f32.mxu0 %vm556_vm0, %v557_v1  ;;  %v41_v3 = vld [vmem:[%s755_s1 + $0x8] sm:$0xff]  ;;  %v124_v5 = vld [vmem:[%s757_s3] sm:$0xff]  ;;  %v126_v7 = vld [vmem:[%s757_s3 + $0x10] sm:$0xff]  ;;  %vm49_vm1 = vcmask 130048   ;;  %vm313_vm2 = vcmask 64512  }
  0x14   :  { %451 = vmatprep.subr.bf16.mxu1 %v555_v0  ;;  %410 = vmatprep.mubr.msk.f32.mxu1 %vm556_vm0, %v557_v1  ;;  %v449_v4 = vpack.c.bf16 %v41_v3, %v40_v2  ;;  %v125_v6 = vld [vmem:[%s757_s3 + $0x8] sm:$0xff]  ;;  %v127_v9 = vld [vmem:[%s757_s3 + $0x18] sm:$0xff]  ;;  %v39_v10 = vld [vmem:[#allocation2] sm:$0xff] }
  0x15   :  { %v452_v8 = vpack.c.bf16 %v125_v6, %v124_v5  ;;  %v455_v11 = vpack.c.bf16 %v127_v9, %v126_v7  ;;  %v128_v12 = vld [vmem:[%s757_s3 + $0x20] sm:$0xff]  ;;  %v129_v13 = vld [vmem:[%s757_s3 + $0x28] sm:$0xff]  ;;  %v130_v15 = vld [vmem:[%s757_s3 + $0x30] sm:$0xff] }
  0x16   :  { %450 = vmatpush3.bf16.msra.mxu0 %v449_v4  ;;  %v458_v14 = vpack.c.bf16 %v129_v13, %v128_v12  ;;  %v131_v16 = vld [vmem:[%s757_s3 + $0x38] sm:$0xff]  ;;  %v132_v18 = vld [vmem:[%s757_s3 + $0x40] sm:$0xff]  ;;  %v133_v19 = vld [vmem:[%s757_s3 + $0x48] sm:$0xff] }
  0x17   :  { %453 = vmatpush3.bf16.msra.mxu1 %v452_v8  ;;  %475 = vmatprep.subr.bf16.mxu0 %v555_v0  ;;  %v461_v17 = vpack.c.bf16 %v131_v16, %v130_v15  ;;  %v464_v20 = vpack.c.bf16 %v133_v19, %v132_v18  ;;  %v134_v21 = vld [vmem:[%s757_s3 + $0x50] sm:$0xff]  ;;  %v135_v22 = vld [vmem:[%s757_s3 + $0x58] sm:$0xff]  ;;  %v136_v24 = vld [vmem:[%s757_s3 + $0x60] sm:$0xff] }
  0x18   :  { %454 = vmatprep.subr.bf16.mxu1 %v555_v0  ;;  %v467_v23 = vpack.c.bf16 %v135_v22, %v134_v21  ;;  %v137_v25 = vld [vmem:[%s757_s3 + $0x68] sm:$0xff]  ;;  %v138_v27 = vld [vmem:[%s757_s3 + $0x70] sm:$0xff]  ;;  %v139_v28 = vld [vmem:[%s757_s3 + $0x78] sm:$0xff] }
  0x19   :  { %376 = vmatmul.mubr.msk.f32.vlgmr.msra.gmra.mrb[0].mxu0 %vm49_vm1, %v39_v10  ;;  %v470_v26 = vpack.c.bf16 %v137_v25, %v136_v24  ;;  %v473_v29 = vpack.c.bf16 %v139_v28, %v138_v27  ;;  %v218_v30 = vld [vmem:[%s759_s5] sm:$0xff]  ;;  %v219_v31 = vld [vmem:[%s759_s5 + $0x8] sm:$0xff]  ;;  %v220_v32 = vld [vmem:[%s759_s5 + $0x10] sm:$0xff] }
  0x1a   :  { %445 = vmatprep.mubr.msk.f32.mxu0 %vm556_vm0, %v557_v1  ;;  %v476_v33 = vpack.c.bf16 %v219_v31, %v218_v30  ;;  %v221_v34 = vld [vmem:[%s759_s5 + $0x18] sm:$0xff]  ;;  %v222_v36 = vld [vmem:[%s759_s5 + $0x20] sm:$0xff]  ;;  %v223_v37 = vld [vmem:[%s759_s5 + $0x28] sm:$0xff] }
  0x1b   :  { %456 = vmatpush3.bf16.msra.mxu1 %v455_v11  ;;  %v479_v35 = vpack.c.bf16 %v221_v34, %v220_v32  ;;  %v482_v38 = vpack.c.bf16 %v223_v37, %v222_v36  ;;  %v224_v39 = vld [vmem:[%s759_s5 + $0x30] sm:$0xff]  ;;  %v225_v40 = vld [vmem:[%s759_s5 + $0x38] sm:$0xff]  ;;  %v226_v42 = vld [vmem:[%s759_s5 + $0x40] sm:$0xff] }
  0x1c   :  { %457 = vmatprep.subr.bf16.mxu1 %v555_v0  ;;  %477 = vmatpush3.bf16.msra.mxu0 %v476_v33  ;;  %v485_v41 = vpack.c.bf16 %v225_v40, %v224_v39  ;;  %v227_v43 = vld [vmem:[%s759_s5 + $0x48] sm:$0xff]  ;;  %v228_v45 = vld [vmem:[%s759_s5 + $0x50] sm:$0xff]  ;;  %v229_v46 = vld [vmem:[%s759_s5 + $0x58] sm:$0xff] }
  0x1d   :  { %478 = vmatprep.subr.bf16.mxu0 %v555_v0  ;;  %v488_v44 = vpack.c.bf16 %v227_v43, %v226_v42  ;;  %v491_v47 = vpack.c.bf16 %v229_v46, %v228_v45  ;;  %v230_v48 = vld [vmem:[%s759_s5 + $0x60] sm:$0xff]  ;;  %v231_v49 = vld [vmem:[%s759_s5 + $0x68] sm:$0xff]  ;;  %v232_v56 = vld [vmem:[%s759_s5 + $0x70] sm:$0xff] }
  0x1e   :  { %v494_v50 = vpack.c.bf16 %v231_v49, %v230_v48  ;;  %v330_v51 = vld [vmem:[%s756_s2] ss:$0 sm:$0xff]  ;;  %v233_v57 = vld [vmem:[%s759_s5 + $0x78] sm:$0xff]  ;;  %s558_s5 = smov [#allocation5]  }
  0x1f   :  { %459 = vmatpush3.bf16.msra.mxu1 %v458_v14  ;;  %v497_v58 = vpack.c.bf16 %v233_v57, %v232_v56  ;;  %v332_v59 = vld [vmem:[%s758_s4] ss:$0 sm:$0xff]  ;;  %s321_s9 = sshll.u32 %s558_s5, 4  ;;  %s322_s9 = int_to_ptr.vmem [resolvable:$true] %s321_s9 }
  0x20   :  { %460 = vmatprep.subr.bf16.mxu1 %v555_v0  ;;  %480 = vmatpush3.bf16.msra.mxu0 %v479_v35  ;;  %s528_s4 = scalar_lea.vmem %s322_s9, 128  ;;  %p533_p9 = scmp.lt.s32.totalorder %s322_s9, %s322_s9 }
  0x21   :  { %481 = vmatprep.subr.bf16.mxu0 %v555_v0  ;;  %p529_p8 = scmp.ne.s32.totalorder %s322_s9, %s528_s4  ;;  %p534_p10 = scmp.lt.s32.totalorder %s528_s4, %s528_s4 }
  0x23   :  { %462 = vmatpush3.bf16.msra.mxu1 %v461_v17  ;;  %p535_p11 = por %p534_p10, %p533_p9 }
  0x24   :  { %463 = vmatprep.subr.bf16.mxu1 %v555_v0  ;;  %483 = vmatpush3.bf16.msra.mxu0 %v482_v38 }
  0x25   :  { %484 = vmatprep.subr.bf16.mxu0 %v555_v0  ;;  %p536_p12 = pnand %p535_p11, %p529_p8 }
  0x27   :  { %465 = vmatpush3.bf16.msra.mxu1 %v464_v20 }
  0x28   :  { %466 = vmatprep.subr.bf16.mxu1 %v555_v0  ;;  %486 = vmatpush3.bf16.msra.mxu0 %v485_v41 }
  0x29   :  { %487 = vmatprep.subr.bf16.mxu0 %v555_v0 }
  0x2b   :  { %468 = vmatpush3.bf16.msra.mxu1 %v467_v23 }
  0x2c   :  { %469 = vmatprep.subr.bf16.mxu1 %v555_v0  ;;  %489 = vmatpush3.bf16.msra.mxu0 %v488_v44 }
  0x2d   :  { %490 = vmatprep.subr.bf16.mxu0 %v555_v0 }
  0x2f   :  { %471 = vmatpush3.bf16.msra.mxu1 %v470_v26 }
  0x30   :  { %472 = vmatprep.subr.bf16.mxu1 %v555_v0  ;;  %492 = vmatpush3.bf16.msra.mxu0 %v491_v47 }
  0x31   :  { %493 = vmatprep.subr.bf16.mxu0 %v555_v0 }
  0x33   :  { %474 = vmatpush3.bf16.msra.mxu1 %v473_v29 }
  0x34   :  { %495 = vmatpush3.bf16.msra.mxu0 %v494_v50 }
  0x35   :  { %496 = vmatprep.subr.bf16.mxu0 %v555_v0  ;;  %v333_v0 = vld [vmem:[%s760_s6] ss:$0 sm:$0xff] }
  0x38   :  { %498 = vmatpush3.bf16.msra.mxu0 %v497_v58 }
  0xec   :  { %v119_v52 = vpop.f32.mrb[0].mxu0 }
  0xed   :  { %v120_v53 = vadd.f32 %v330_v51, %v119_v52  ;;  %v377_v54 = vpop.f32.mrb[1].mxu0 }
  0xef   :  { %v123_v55 = vmax.f32 %v120_v53, 0.0 }
  0xf1   :  { %411 = vmatmul.mubr.f32.vlgmr.msra.gmra.mrb[0].mxu1 %v123_v55 }
 0x1c4   :  { %v213_v60 = vpop.f32.mrb[0].mxu1 }
 0x1c5   :  { %v214_v61 = vadd.f32 %v332_v59, %v213_v60  ;;  %v412_v62 = vpop.f32.mrb[1].mxu1 }
 0x1c7   :  { %v217_v63 = vmax.f32 %v214_v61, 0.0 }
 0x1c9   :  { %446 = vmatmul.mubr.f32.vlgmr.msra.gmra.mrb[2].mxu0 %v217_v63 }
 0x29c   :  { %v307_v1 = vpop.f32.mrb[2].mxu0 }
 0x29d   :  { %v308_v2 = vadd.f32 %v333_v0, %v307_v1  ;;  %v447_v3 = vpop.f32.mrb[3].mxu0 }
 0x29f   :  { %504 = vtanh.f32 %v308_v2 }
 0x2a9   :  { %v505_v4 = vpop.eup %504 }
 0x2aa   :  { %v312_v5 = vmul.f32 2.0, %v505_v4 }
 0x2ac   :  { %314 = vst.msk [vmem:[#allocation5] sm:$0xff] %vm313_vm2, %v312_v5 }
 0x2ad   :  { %539 = shalt.err (!%p536_p12)
}
 0x2ae   :  { %s540_s11 = scalar_lea.hbm %s761_s7, 128 }
 0x2af   :  { %p541_p13 = scmp.ne.s32.totalorder %s761_s7, %s540_s11  ;;  %p544_p0 = scmp.lt.u32.totalorder %s540_s11, %s761_s7 }
 0x2b1   :  { %p546_p1 = pnand %p544_p0, %p541_p13 }
 0x2b3   :  { %549 = shalt.err (!%p546_p1)
}
 0x2b4   :  { %324 = dma.vmem_to_hbm [thread:$0]  %s322_s9, 128, %s761_s7, [#allocation4]  }
 0x2b5   :  { %552 = dma.done.wait [#allocation4], 128  }
 0x2b6   :  { %553 = vsyncadd [#allocation4], 4294967168 }
 0x2b7   :  { %328 = vsyncpa [#allocation3], 1 }
 0x2b8   :  { %329 = vsyncpa [#allocation4], 1 }

</bundles_post_ra>
